<compile_context>
chip_gen: v7x
topology: tpu7x:2x2x1
jax: 0.10.0
libtpu: 0.0.40
codegen_flags: <defaults>
</compile_context>

<pallas_src>
import jax
import jax.numpy as jnp
from jax.experimental import pallas as pl
from jax.experimental.pallas import tpu as pltpu


def _round_up(x, m):
    return ((x + m - 1) // m) * m


def qnet_kernel(x_ref, w1_ref, b1_ref, w2_ref, b2_ref, w3_ref, b3_ref, q_ref):
    # One batch tile per grid step. Matmuls accumulate in f32 on the MXU;
    # bias-add / ReLU stay in f32 on the VPU (v5e has no bf16 VPU).
    mm_dt = w1_ref.dtype
    x = x_ref[...]

    h1 = jnp.dot(x, w1_ref[...], preferred_element_type=jnp.float32) + b1_ref[...]
    h1 = jnp.maximum(h1, 0.0)

    h2 = jnp.dot(h1.astype(mm_dt), w2_ref[...],
                 preferred_element_type=jnp.float32) + b2_ref[...]
    h2 = jnp.maximum(h2, 0.0)

    q = jnp.dot(h2.astype(mm_dt), w3_ref[...],
                preferred_element_type=jnp.float32) + b3_ref[...]
    q = jnp.maximum(q, 0.0)

    q_ref[...] = q.astype(q_ref.dtype)


def prepare_qnet_params(params, *, matmul_dtype=jnp.bfloat16):
    """One-time (not per-forward) padding / casting of the QNet parameters.

    * fc1 hidden dim padded 64 -> 128 so h1 is lane-dense.
    * fc3 output columns padded to a multiple of 128 (unmasked full-lane vst).
    * MXU-facing weights cast to `matmul_dtype` (bf16 by default; the MXU is
      bf16-native on every generation); biases stay f32 so bias-add / ReLU is
      f32 on the VPU everywhere.
    """
    in_dims, h1 = params["w1"].shape
    h2 = params["w2"].shape[1]
    n_actions = params["w3"].shape[1]

    h1p = _round_up(max(h1, 128), 128)
    h2p = _round_up(max(h2, 128), 128)
    nq = _round_up(max(n_actions, 128), 128)

    w1 = jnp.pad(params["w1"], ((0, 0), (0, h1p - h1))).astype(matmul_dtype)
    b1 = jnp.pad(params["b1"], ((0, 0), (0, h1p - h1))).astype(jnp.float32)
    w2 = jnp.pad(params["w2"], ((0, h1p - h1), (0, h2p - h2))).astype(matmul_dtype)
    b2 = jnp.pad(params["b2"], ((0, 0), (0, h2p - h2))).astype(jnp.float32)
    w3 = jnp.pad(params["w3"], ((0, h2p - h2), (0, nq - n_actions))).astype(matmul_dtype)
    b3 = jnp.pad(params["b3"], ((0, 0), (0, nq - n_actions))).astype(jnp.float32)

    return {"w1": w1, "b1": b1, "w2": w2, "b2": b2, "w3": w3, "b3": b3,
            "input_dims": in_dims, "n_actions": n_actions}


def qnet_forward(state, prep, *, tb=512, out_dtype=jnp.float32):
    """state: (B, input_dims) f32; prep: output of prepare_qnet_params().

    tb:        max batch-tile rows per grid step (default 512 -- smaller tiles
               are per-step-overhead-bound for this tiny network).
    out_dtype: dtype of the padded Q writeback (bf16 halves HBM write bytes).
    """
    B, in_dims = state.shape
    assert in_dims == prep["input_dims"]
    n_actions = prep["n_actions"]
    nq = prep["w3"].shape[1]
    mm_dt = prep["w1"].dtype

    # Batch tiling: sublane multiple 16 for bf16-packed tiles, else 8.
    sub = 16 if (mm_dt == jnp.bfloat16 or out_dtype == jnp.bfloat16) else 8
    b_pad = _round_up(B, sub)
    TB = min(_round_up(tb, sub), b_pad)
    if b_pad >= 2 * sub:
        # Cap the tile at ~half the padded batch so grid >= 2 -> both v7x
        # TensorCores get work via the "parallel" axis (no effect on v5e/v6e).
        TB = min(TB, _round_up(pl.cdiv(b_pad, 2), sub))
    Bp = _round_up(B, TB)

    x = state.astype(mm_dt)
    if Bp != B:
        x = jnp.pad(x, ((0, Bp - B), (0, 0)))

    grid = (Bp // TB,)

    # Weight/bias blocks are full arrays with constant index_maps -> DMA'd
    # once, VMEM-resident across every batch tile; only x and q stream.
    # TODO(synk): single-buffer these constant blocks (pipeline_mode) or pack
    # all params into one pre-concatenated 128-lane slab to trim entry DMAs.
    def full(arr):
        return pl.BlockSpec(arr.shape, lambda i: (0, 0))

    out = pl.pallas_call(
        qnet_kernel,
        out_shape=jax.ShapeDtypeStruct((Bp, nq), out_dtype),
        grid=grid,
        in_specs=[
            pl.BlockSpec((TB, in_dims), lambda i: (i, 0)),
            full(prep["w1"]), full(prep["b1"]),
            full(prep["w2"]), full(prep["b2"]),
            full(prep["w3"]), full(prep["b3"]),
        ],
        out_specs=pl.BlockSpec((TB, nq), lambda i: (i, 0)),
        compiler_params=pltpu.CompilerParams(
            dimension_semantics=("parallel",),
        ),
    )(x, prep["w1"], prep["b1"], prep["w2"], prep["b2"], prep["w3"], prep["b3"])

    # TODO(synk): for the DQN action-selection path, fuse the max/argmax over
    # actions into the kernel and emit (TB, 1) instead of the full padded Q.
    return out[:B, :n_actions]


def init_qnet_params(key, input_dims, n_actions):
    """Deterministic init mimicking PyTorch Linear default U(-1/sqrt(fan_in), +).

    Weights are stored transposed vs PyTorch ((in, out)) so y = x @ W + b.
    """
    def linear(key, fan_in, fan_out):
        kw, kb = jax.random.split(key)
        bound = 1.0 / jnp.sqrt(float(fan_in))
        w = jax.random.uniform(kw, (fan_in, fan_out), jnp.float32, -bound, bound)
        b = jax.random.uniform(kb, (1, fan_out), jnp.float32, -bound, bound)
        return w, b

    k1, k2, k3 = jax.random.split(key, 3)
    w1, b1 = linear(k1, input_dims, 64)
    w2, b2 = linear(k2, 64, 256)
    w3, b3 = linear(k3, 256, n_actions)
    return {"w1": w1, "b1": b1, "w2": w2, "b2": b2, "w3": w3, "b3": b3}


def qnet_reference(state, p):
    """Pure-JAX f32 reference for correctness checks."""
    h1 = jnp.maximum(state @ p["w1"] + p["b1"], 0.0)
    h2 = jnp.maximum(h1 @ p["w2"] + p["b2"], 0.0)
    return jnp.maximum(h2 @ p["w3"] + p["b3"], 0.0)


if __name__ == "__main__":
    key = jax.random.PRNGKey(0)
    k_params, k_state1, k_state2 = jax.random.split(key, 3)

    input_dims = 16
    n_actions = 8

    params = init_qnet_params(k_params, input_dims, n_actions)

    # One-time parameter preparation (hoisted out of the forward hot path).
    prep_f32 = prepare_qnet_params(params, matmul_dtype=jnp.float32)
    prep_bf16 = prepare_qnet_params(params)  # bf16 MXU inputs by default

    # 1) Tiny inference-style batch, f32 path (exact vs reference; padding of
    #    hidden/output dims contributes exact zeros).
    state_small = jax.random.normal(k_state1, (2, input_dims), jnp.float32)
    q_small = jax.block_until_ready(qnet_forward(state_small, prep_f32))
    q_small_ref = qnet_reference(state_small, params)
    assert q_small.shape == (2, n_actions)
    assert jnp.allclose(q_small, q_small_ref, atol=1e-5, rtol=1e-5), \
        "f32 small-batch mismatch vs JAX reference"

    # 2) Multi-tile batch: with the default tb, the v7x grid>=2 cap splits the
    #    padded batch into 2 grid steps (exercises pipelining + padded rows).
    state_med = jax.random.normal(k_state2, (20, input_dims), jnp.float32)
    q_med = jax.block_until_ready(qnet_forward(state_med, prep_f32))
    q_med_ref = qnet_reference(state_med, params)
    assert q_med.shape == (20, n_actions)
    assert jnp.allclose(q_med, q_med_ref, atol=1e-5, rtol=1e-5), \
        "f32 multi-tile mismatch vs JAX reference"

    # 3) Default bf16 MXU-input path (f32 accumulation / bias / ReLU).
    q_bf16 = jax.block_until_ready(qnet_forward(state_med, prep_bf16))
    err = jnp.max(jnp.abs(q_bf16 - q_med_ref))
    assert err < 5e-2 * (1.0 + jnp.max(jnp.abs(q_med_ref))), \
        "bf16 matmul path diverges too far from f32 reference"

    # 4) bf16 output writeback (halved Q store bytes).
    q_bf16o = jax.block_until_ready(
        qnet_forward(state_med, prep_bf16, out_dtype=jnp.bfloat16))
    err_o = jnp.max(jnp.abs(q_bf16o.astype(jnp.float32) - q_med_ref))
    assert err_o < 5e-2 * (1.0 + jnp.max(jnp.abs(q_med_ref))), \
        "bf16-output path diverges too far from f32 reference"

    print("KERNEL_OK")
</pallas_src>

<mosaic_0001>
module attributes {stable_mosaic.version = 11 : i64} {
  func.func @qnet_kernel(%arg0: i32, %arg1: memref<8x16xf32, #tpu.memory_space<vmem>>, %arg2: memref<16x128xf32, #tpu.memory_space<vmem>>, %arg3: memref<1x128xf32, #tpu.memory_space<vmem>>, %arg4: memref<128x256xf32, #tpu.memory_space<vmem>>, %arg5: memref<1x256xf32, #tpu.memory_space<vmem>>, %arg6: memref<256x128xf32, #tpu.memory_space<vmem>>, %arg7: memref<1x128xf32, #tpu.memory_space<vmem>>, %arg8: memref<8x128xf32, #tpu.memory_space<vmem>>) attributes {dimension_semantics = [#tpu.dimension_semantics<parallel>], iteration_bounds = array<i64: 1>, scalar_prefetch = 0 : i64, scratch_operands = 0 : i64, tpu.core_type = #tpu.core_type<tc>, window_params = [{transform_indices = @transform_0, window_bounds = array<i64: 8, 16>}, {pipeline_mode = #tpu.pipeline_mode<synchronous>, transform_indices = @transform_1, window_bounds = array<i64: 16, 128>}, {pipeline_mode = #tpu.pipeline_mode<synchronous>, transform_indices = @transform_2, window_bounds = array<i64: 1, 128>}, {pipeline_mode = #tpu.pipeline_mode<synchronous>, transform_indices = @transform_3, window_bounds = array<i64: 128, 256>}, {pipeline_mode = #tpu.pipeline_mode<synchronous>, transform_indices = @transform_4, window_bounds = array<i64: 1, 256>}, {pipeline_mode = #tpu.pipeline_mode<synchronous>, transform_indices = @transform_5, window_bounds = array<i64: 256, 128>}, {pipeline_mode = #tpu.pipeline_mode<synchronous>, transform_indices = @transform_6, window_bounds = array<i64: 1, 128>}, {transform_indices = @transform_7, window_bounds = array<i64: 8, 128>}]} {
    %c0 = arith.constant 0 : index
    %c0_0 = arith.constant 0 : index
    %0 = vector.load %arg1[%c0, %c0_0] : memref<8x16xf32, #tpu.memory_space<vmem>>, vector<8x16xf32>
    %c0_1 = arith.constant 0 : index
    %c0_2 = arith.constant 0 : index
    %1 = vector.load %arg2[%c0_1, %c0_2] : memref<16x128xf32, #tpu.memory_space<vmem>>, vector<16x128xf32>
    %cst = arith.constant dense<0.000000e+00> : vector<8x128xf32>
    %2 = tpu.matmul %0, %1, %cst {dimension_numbers = #tpu.dot_dimension_numbers<[1], [0], [0], [1], [0, 0, 1, 1], [], []>} : vector<8x16xf32>, vector<16x128xf32>, vector<8x128xf32> -> vector<8x128xf32>
    %c0_3 = arith.constant 0 : index
    %c0_4 = arith.constant 0 : index
    %3 = vector.load %arg3[%c0_3, %c0_4] : memref<1x128xf32, #tpu.memory_space<vmem>>, vector<1x128xf32>
    %4 = vector.broadcast %3 : vector<1x128xf32> to vector<8x128xf32>
    %5 = arith.addf %2, %4 : vector<8x128xf32>
    %cst_5 = arith.constant 0.000000e+00 : f32
    %6 = vector.broadcast %cst_5 : f32 to vector<8x128xf32>
    %7 = arith.maximumf %5, %6 : vector<8x128xf32>
    %c0_6 = arith.constant 0 : index
    %c0_7 = arith.constant 0 : index
    %8 = vector.load %arg4[%c0_6, %c0_7] : memref<128x256xf32, #tpu.memory_space<vmem>>, vector<128x256xf32>
    %cst_8 = arith.constant dense<0.000000e+00> : vector<8x256xf32>
    %9 = tpu.matmul %7, %8, %cst_8 {dimension_numbers = #tpu.dot_dimension_numbers<[1], [0], [0], [1], [0, 0, 1, 1], [], []>} : vector<8x128xf32>, vector<128x256xf32>, vector<8x256xf32> -> vector<8x256xf32>
    %c0_9 = arith.constant 0 : index
    %c0_10 = arith.constant 0 : index
    %10 = vector.load %arg5[%c0_9, %c0_10] : memref<1x256xf32, #tpu.memory_space<vmem>>, vector<1x256xf32>
    %11 = vector.broadcast %10 : vector<1x256xf32> to vector<8x256xf32>
    %12 = arith.addf %9, %11 : vector<8x256xf32>
    %cst_11 = arith.constant 0.000000e+00 : f32
    %13 = vector.broadcast %cst_11 : f32 to vector<8x256xf32>
    %14 = arith.maximumf %12, %13 : vector<8x256xf32>
    %c0_12 = arith.constant 0 : index
    %c0_13 = arith.constant 0 : index
    %15 = vector.load %arg6[%c0_12, %c0_13] : memref<256x128xf32, #tpu.memory_space<vmem>>, vector<256x128xf32>
    %cst_14 = arith.constant dense<0.000000e+00> : vector<8x128xf32>
    %16 = tpu.matmul %14, %15, %cst_14 {dimension_numbers = #tpu.dot_dimension_numbers<[1], [0], [0], [1], [0, 0, 1, 1], [], []>} : vector<8x256xf32>, vector<256x128xf32>, vector<8x128xf32> -> vector<8x128xf32>
    %c0_15 = arith.constant 0 : index
    %c0_16 = arith.constant 0 : index
    %17 = vector.load %arg7[%c0_15, %c0_16] : memref<1x128xf32, #tpu.memory_space<vmem>>, vector<1x128xf32>
    %18 = vector.broadcast %17 : vector<1x128xf32> to vector<8x128xf32>
    %19 = arith.addf %16, %18 : vector<8x128xf32>
    %cst_17 = arith.constant 0.000000e+00 : f32
    %20 = vector.broadcast %cst_17 : f32 to vector<8x128xf32>
    %21 = arith.maximumf %19, %20 : vector<8x128xf32>
    %c0_18 = arith.constant 0 : index
    %c0_19 = arith.constant 0 : index
    %22 = vector.load %arg8[%c0_18, %c0_19] : memref<8x128xf32, #tpu.memory_space<vmem>>, vector<8x128xf32>
    tpu.vector_store %arg8[%c0_18, %c0_19], %21 {strides = array<i32>} : memref<8x128xf32, #tpu.memory_space<vmem>>, vector<8x128xf32>,
    return
  }
  func.func @transform_0(%arg0: i32) -> (i32, i32) {
    %c0_i32 = arith.constant 0 : i32
    %c0_i32_0 = arith.constant 0 : i32
    return %arg0, %c0_i32 : i32, i32
  }
  func.func @transform_1(%arg0: i32) -> (i32, i32) {
    %c0_i32 = arith.constant 0 : i32
    %c0_i32_0 = arith.constant 0 : i32
    %c0_i32_1 = arith.constant 0 : i32
    return %c0_i32, %c0_i32_0 : i32, i32
  }
  func.func @transform_2(%arg0: i32) -> (i32, i32) {
    %c0_i32 = arith.constant 0 : i32
    %c0_i32_0 = arith.constant 0 : i32
    %c0_i32_1 = arith.constant 0 : i32
    return %c0_i32, %c0_i32_0 : i32, i32
  }
  func.func @transform_3(%arg0: i32) -> (i32, i32) {
    %c0_i32 = arith.constant 0 : i32
    %c0_i32_0 = arith.constant 0 : i32
    %c0_i32_1 = arith.constant 0 : i32
    return %c0_i32, %c0_i32_0 : i32, i32
  }
  func.func @transform_4(%arg0: i32) -> (i32, i32) {
    %c0_i32 = arith.constant 0 : i32
    %c0_i32_0 = arith.constant 0 : i32
    %c0_i32_1 = arith.constant 0 : i32
    return %c0_i32, %c0_i32_0 : i32, i32
  }
  func.func @transform_5(%arg0: i32) -> (i32, i32) {
    %c0_i32 = arith.constant 0 : i32
    %c0_i32_0 = arith.constant 0 : i32
    %c0_i32_1 = arith.constant 0 : i32
    return %c0_i32, %c0_i32_0 : i32, i32
  }
  func.func @transform_6(%arg0: i32) -> (i32, i32) {
    %c0_i32 = arith.constant 0 : i32
    %c0_i32_0 = arith.constant 0 : i32
    %c0_i32_1 = arith.constant 0 : i32
    return %c0_i32, %c0_i32_0 : i32, i32
  }
  func.func @transform_7(%arg0: i32) -> (i32, i32) {
    %c0_i32 = arith.constant 0 : i32
    %c0_i32_0 = arith.constant 0 : i32
    return %arg0, %c0_i32 : i32, i32
  }
}

</mosaic_0001>

<bundles_post_ra>
// kernel: tpu_custom_call.1
= control target key start
LH: loop header
LB: loop body
LE: loop exit
PB: predicated region body
PF: predicated region fallthrough
CT: control target
= control target key end

     0   :  { %12 = vsyncpa [#allocation3], 0  ;;  %s782_s0 = inlined_call_operand.hbm [shape: f32[8,16], index: 0, kind: input, shape index: {}]   ;;  %s783_s1 = inlined_call_operand.hbm [shape: f32[16,128], index: 1, kind: input, shape index: {}]   ;;  %s784_s2 = inlined_call_operand.vmem [shape: f32[1,128], index: 2, kind: input, shape index: {}]   ;;  %s785_s3 = inlined_call_operand.hbm [shape: f32[128,256], index: 3, kind: input, shape index: {}]   ;;  %s786_s4 = inlined_call_operand.vmem [shape: f32[1,256], index: 4, kind: input, shape index: {}]   ;;  %s787_s5 = inlined_call_operand.hbm [shape: f32[256,128], index: 5, kind: input, shape index: {}]   ;;  %s788_s6 = inlined_call_operand.vmem [shape: f32[1,128], index: 6, kind: input, shape index: {}]   ;;  %s789_s7 = inlined_call_operand.hbm [shape: f32[8,128], index: 7, kind: output, shape index: {}]  }
   0x1   :  { %13 = vsyncpa [#allocation6], 0 }
   0x2   :  { %14 = vsyncpa [#allocation9], 0 }
   0x3   :  { %15 = vsyncpa [#allocation4], 0  ;;  %s655_s24 = smov [#allocation5]   ;;  %s537_s28 = scalar_lea.hbm %s783_s1, 256 }
   0x4   :  { %s31_s25 = sshll.u32 %s655_s24, 4  ;;  %p538_p0 = scmp.ne.s32.totalorder %s783_s1, %s537_s28  ;;  %s32_s25 = int_to_ptr.vmem [resolvable:$true] %s31_s25 }
   0x5   :  { %p541_p1 = scmp.lt.u32.totalorder %s537_s28, %s783_s1 }
   0x7   :  { %p543_p2 = pnand %p541_p1, %p538_p0 }
   0x9   :  { %546 = shalt.err (!%p543_p2)
}
   0xa   :  { %s547_s10 = scalar_lea.vmem %s32_s25, 256  ;;  %p552_p4 = scmp.lt.s32.totalorder %s32_s25, %s32_s25 }
   0xb   :  { %p548_p3 = scmp.ne.s32.totalorder %s32_s25, %s547_s10  ;;  %p553_p5 = scmp.lt.s32.totalorder %s547_s10, %s547_s10 }
   0xd   :  { %p554_p6 = por %p553_p5, %p552_p4 }
   0xf   :  { %p555_p7 = pnand %p554_p6, %p548_p3 }
  0x11   :  { %558 = shalt.err (!%p555_p7)
}
  0x12   :  { %s656_s11 = smov 128   ;;  %s657_s12 = smov 8  }
  0x13   :  { %37 = dma.hbm_to_vmem [thread:$0]  %s783_s1, 256, %s32_s25, [#allocation6], %s656_s11, %s656_s11, %s657_s12  }
  0x14   :  { %s658_s15 = smov [#allocation2]   ;;  %s659_s17 = smov [#allocation7]  }
  0x15   :  { %s22_s16 = sshll.u32 %s658_s15, 4  ;;  %s45_s18 = sshll.u32 %s659_s17, 4  ;;  %s23_s16 = int_to_ptr.vmem [resolvable:$true] %s22_s16  ;;  %s46_s18 = int_to_ptr.vmem [resolvable:$true] %s45_s18 }
  0x16   :  { %s559_s21 = scalar_lea.hbm %s782_s0, 128 }
  0x17   :  { %p560_p8 = scmp.ne.s32.totalorder %s782_s0, %s559_s21  ;;  %p563_p9 = scmp.lt.u32.totalorder %s559_s21, %s782_s0 }
  0x19   :  { %p565_p10 = pnand %p563_p9, %p560_p8 }
  0x1b   :  { %568 = shalt.err (!%p565_p10)
}
  0x1c   :  { %s569_s1 = scalar_lea.vmem %s23_s16, 128  ;;  %p574_p12 = scmp.lt.s32.totalorder %s23_s16, %s23_s16 }
  0x1d   :  { %p570_p11 = scmp.ne.s32.totalorder %s23_s16, %s569_s1  ;;  %p575_p13 = scmp.lt.s32.totalorder %s569_s1, %s569_s1 }
  0x1f   :  { %p576_p0 = por %p575_p13, %p574_p12 }
  0x21   :  { %p577_p1 = pnand %p576_p0, %p570_p11 }
  0x23   :  { %580 = shalt.err (!%p577_p1)
}
  0x24   :  { %25 = dma.hbm_to_vmem [thread:$0]  %s782_s0, 128, %s23_s16, [#allocation3]  }
  0x25   :  { %s581_s30 = scalar_lea.hbm %s785_s3, 4096 }
  0x26   :  { %p582_p2 = scmp.ne.s32.totalorder %s785_s3, %s581_s30  ;;  %p585_p3 = scmp.lt.u32.totalorder %s581_s30, %s785_s3 }
  0x28   :  { %p587_p4 = pnand %p585_p3, %p582_p2 }
  0x2a   :  { %590 = shalt.err (!%p587_p4)
}
  0x2b   :  { %s591_s14 = scalar_lea.vmem %s46_s18, 4096  ;;  %p596_p6 = scmp.lt.s32.totalorder %s46_s18, %s46_s18 }
  0x2c   :  { %p592_p5 = scmp.ne.s32.totalorder %s46_s18, %s591_s14  ;;  %p597_p7 = scmp.lt.s32.totalorder %s591_s14, %s591_s14 }
  0x2e   :  { %p598_p8 = por %p597_p7, %p596_p6 }
  0x30   :  { %p599_p9 = pnand %p598_p8, %p592_p5 }
  0x32   :  { %602 = shalt.err (!%p599_p9)
}
  0x33   :  { %s660_s0 = smov 256   ;;  %s661_s15 = smov 16  }
  0x34   :  { %51 = dma.hbm_to_vmem [thread:$0]  %s785_s3, 4096, %s46_s18, [#allocation6], %s660_s0, %s660_s0, %s661_s15  }
  0x35   :  { %s662_s19 = smov [#allocation8]   ;;  %s603_s23 = scalar_lea.hbm %s787_s5, 4096 }
  0x36   :  { %s59_s20 = sshll.u32 %s662_s19, 4  ;;  %p604_p10 = scmp.ne.s32.totalorder %s787_s5, %s603_s23  ;;  %s60_s20 = int_to_ptr.vmem [resolvable:$true] %s59_s20 }
  0x37   :  { %p607_p11 = scmp.lt.u32.totalorder %s603_s23, %s787_s5 }
  0x39   :  { %p609_p12 = pnand %p607_p11, %p604_p10 }
  0x3b   :  { %612 = shalt.err (!%p609_p12)
}
  0x3c   :  { %s613_s27 = scalar_lea.vmem %s60_s20, 4096  ;;  %p618_p0 = scmp.lt.s32.totalorder %s60_s20, %s60_s20 }
  0x3d   :  { %p614_p13 = scmp.ne.s32.totalorder %s60_s20, %s613_s27  ;;  %p619_p1 = scmp.lt.s32.totalorder %s613_s27, %s613_s27 }
  0x3f   :  { %p620_p2 = por %p619_p1, %p618_p0 }
  0x41   :  { %p621_p3 = pnand %p620_p2, %p614_p13 }
  0x43   :  { %624 = shalt.err (!%p621_p3)
}
  0x44   :  { %65 = dma.hbm_to_vmem [thread:$0]  %s787_s5, 4096, %s60_s20, [#allocation9], %s656_s11, %s656_s11, %s657_s12  }
  0x45   :  { %647 = dma.done.wait [#allocation3], 128  }
  0x46   :  { %648 = vsyncadd [#allocation3], 4294967168 }
  0x47   :  { %649 = dma.done.wait [#allocation6], 4352  }
  0x48   :  { %650 = vsyncadd [#allocation6], 4294962944 }
  0x49   :  { %651 = dma.done.wait [#allocation9], 4096  }
  0x4a   :  { %652 = vsyncadd [#allocation9], 4294963200  ;;  %v663_v0 = vmov 0.0|0.0   ;;  %vm664_vm0 = vmmov 0   ;;  %v665_v1 = vmov 0.0   ;;  %v81_v2 = vld [vmem:[#allocation5] sm:$0xff] }
  0x4b   :  { %458 = vmatprep.subr.bf16.mxu0 %v663_v0  ;;  %455 = vmatprep.mubr.msk.f32.mxu0 %vm664_vm0, %v665_v1  ;;  %v82_v3 = vld [vmem:[#allocation5 + $0x8] sm:$0xff]  ;;  %v80_v5 = vld [vmem:[#allocation2] sm:$0xff]  ;;  %v165_v8 = vld [vmem:[#allocation7] sm:$0xff]  ;;  %vm90_vm1 = vcmask 130048   ;;  %s666_s30 = smov [#allocation10]  }
  0x4c   :  { %273 = vmatprep.mubr.f32.mxu1 %v665_v1  ;;  %v459_v4 = vpack.c.bf16 %v82_v3, %v81_v2  ;;  %v166_v6 = vld [vmem:[#allocation7 + $0x8] sm:$0xff]  ;;  %v168_v7 = vld [vmem:[#allocation7 + $0x18] sm:$0xff]  ;;  %v167_v10 = vld [vmem:[#allocation7 + $0x10] sm:$0xff] }
  0x4d   :  { %v461_v9 = vpack.c.bf16 %v168_v7, %v166_v6  ;;  %v170_v11 = vld [vmem:[#allocation7 + $0x28] sm:$0xff]  ;;  %v172_v12 = vld [vmem:[#allocation7 + $0x38] sm:$0xff]  ;;  %v463_v13 = vpack.c.bf16 %v167_v10, %v165_v8  ;;  %v169_v15 = vld [vmem:[#allocation7 + $0x20] sm:$0xff] }
  0x4e   :  { %460 = vmatpush3.bf16.msra.mxu0 %v459_v4  ;;  %v465_v14 = vpack.c.bf16 %v172_v12, %v170_v11  ;;  %v171_v16 = vld [vmem:[#allocation7 + $0x30] sm:$0xff]  ;;  %v174_v17 = vld [vmem:[#allocation7 + $0x48] sm:$0xff]  ;;  %v176_v18 = vld [vmem:[#allocation7 + $0x58] sm:$0xff] }
  0x4f   :  { %462 = vmatprep.subr.bf16.mxu1 %v461_v9  ;;  %v467_v19 = vpack.c.bf16 %v171_v16, %v169_v15  ;;  %v469_v20 = vpack.c.bf16 %v176_v18, %v174_v17  ;;  %v173_v21 = vld [vmem:[#allocation7 + $0x40] sm:$0xff]  ;;  %v175_v22 = vld [vmem:[#allocation7 + $0x50] sm:$0xff]  ;;  %v178_v23 = vld [vmem:[#allocation7 + $0x68] sm:$0xff] }
  0x50   :  { %464 = vmatpush1.bf16.msra.mxu1 %v463_v13  ;;  %v180_v24 = vld [vmem:[#allocation7 + $0x78] sm:$0xff]  ;;  %v471_v25 = vpack.c.bf16 %v175_v22, %v173_v21  ;;  %v177_v27 = vld [vmem:[#allocation7 + $0x60] sm:$0xff]  ;;  %v179_v28 = vld [vmem:[#allocation7 + $0x70] sm:$0xff] }
  0x51   :  { %456 = vmatmul.mubr.msk.f32.vlgmr.msra.gmra.mrb[0].mxu0 %vm90_vm1, %v80_v5  ;;  %466 = vmatprep.subr.bf16.mxu1 %v465_v14  ;;  %v473_v26 = vpack.c.bf16 %v180_v24, %v178_v23  ;;  %v182_v29 = vld [vmem:[#allocation7 + $0x88] sm:$0xff]  ;;  %v184_v30 = vld [vmem:[#allocation7 + $0x98] sm:$0xff]  ;;  %v475_v31 = vpack.c.bf16 %v179_v28, %v177_v27  ;;  %v181_v33 = vld [vmem:[#allocation7 + $0x80] sm:$0xff] }
  0x52   :  { %v477_v32 = vpack.c.bf16 %v184_v30, %v182_v29  ;;  %v183_v34 = vld [vmem:[#allocation7 + $0x90] sm:$0xff]  ;;  %v186_v35 = vld [vmem:[#allocation7 + $0xa8] sm:$0xff]  ;;  %v188_v36 = vld [vmem:[#allocation7 + $0xb8] sm:$0xff] }
  0x53   :  { %v479_v37 = vpack.c.bf16 %v183_v34, %v181_v33  ;;  %v481_v38 = vpack.c.bf16 %v188_v36, %v186_v35  ;;  %v185_v39 = vld [vmem:[#allocation7 + $0xa0] sm:$0xff]  ;;  %v187_v40 = vld [vmem:[#allocation7 + $0xb0] sm:$0xff]  ;;  %v190_v41 = vld [vmem:[#allocation7 + $0xc8] sm:$0xff] }
  0x54   :  { %468 = vmatpush1.bf16.msra.mxu1 %v467_v19  ;;  %v192_v42 = vld [vmem:[#allocation7 + $0xd8] sm:$0xff]  ;;  %v483_v43 = vpack.c.bf16 %v187_v40, %v185_v39  ;;  %v189_v45 = vld [vmem:[#allocation7 + $0xc0] sm:$0xff]  ;;  %v191_v46 = vld [vmem:[#allocation7 + $0xd0] sm:$0xff] }
  0x55   :  { %470 = vmatprep.subr.bf16.mxu1 %v469_v20  ;;  %v485_v44 = vpack.c.bf16 %v192_v42, %v190_v41  ;;  %v487_v47 = vpack.c.bf16 %v191_v46, %v189_v45  ;;  %v194_v48 = vld [vmem:[#allocation7 + $0xe8] sm:$0xff]  ;;  %v196_v49 = vld [vmem:[#allocation7 + $0xf8] sm:$0xff]  ;;  %v193_v51 = vld [vmem:[#allocation7 + $0xe0] sm:$0xff] }
  0x56   :  { %v489_v50 = vpack.c.bf16 %v196_v49, %v194_v48  ;;  %v195_v52 = vld [vmem:[#allocation7 + $0xf0] sm:$0xff]  ;;  %v298_v54 = vld [vmem:[#allocation8 + $0x80] sm:$0xff]  ;;  %v299_v55 = vld [vmem:[#allocation8 + $0x88] sm:$0xff] }
  0x57   :  { %v491_v53 = vpack.c.bf16 %v195_v52, %v193_v51  ;;  %v282_v56 = vld [vmem:[#allocation8] sm:$0xff]  ;;  %v493_v57 = vpack.c.bf16 %v299_v55, %v298_v54  ;;  %v283_v58 = vld [vmem:[#allocation8 + $0x8] sm:$0xff]  ;;  %v300_v59 = vld [vmem:[#allocation8 + $0x90] sm:$0xff] }
  0x58   :  { %472 = vmatpush1.bf16.msra.mxu1 %v471_v25  ;;  %v301_v60 = vld [vmem:[#allocation8 + $0x98] sm:$0xff]  ;;  %v495_v61 = vpack.c.bf16 %v283_v58, %v282_v56  ;;  %v284_v63 = vld [vmem:[#allocation8 + $0x10] sm:$0xff]  ;;  %v302_v1 = vld [vmem:[#allocation8 + $0xa0] sm:$0xff] }
  0x59   :  { %474 = vmatprep.subr.bf16.mxu1 %v473_v26  ;;  %v497_v62 = vpack.c.bf16 %v301_v60, %v300_v59  ;;  %v285_v0 = vld [vmem:[#allocation8 + $0x18] sm:$0xff]  ;;  %494 = vmatprep.subr.bf16.mxu0 %v493_v57  ;;  %v303_v2 = vld [vmem:[#allocation8 + $0xa8] sm:$0xff]  ;;  %v286_v5 = vld [vmem:[#allocation8 + $0x20] sm:$0xff] }
  0x5a   :  { %496 = vmatpush3.bf16.msra.mxu0 %v495_v61  ;;  %v499_v3 = vpack.c.bf16 %v285_v0, %v284_v63  ;;  %v501_v4 = vpack.c.bf16 %v303_v2, %v302_v1  ;;  %v287_v6 = vld [vmem:[#allocation8 + $0x28] sm:$0xff]  ;;  %v304_v7 = vld [vmem:[#allocation8 + $0xb0] sm:$0xff]  ;;  %v305_v8 = vld [vmem:[#allocation8 + $0xb8] sm:$0xff] }
  0x5b   :  { %498 = vmatprep.subr.bf16.mxu0 %v497_v62  ;;  %v503_v9 = vpack.c.bf16 %v287_v6, %v286_v5  ;;  %v505_v10 = vpack.c.bf16 %v305_v8, %v304_v7  ;;  %v288_v11 = vld [vmem:[#allocation8 + $0x30] sm:$0xff]  ;;  %v289_v12 = vld [vmem:[#allocation8 + $0x38] sm:$0xff]  ;;  %v306_v13 = vld [vmem:[#allocation8 + $0xc0] sm:$0xff] }
  0x5c   :  { %476 = vmatpush1.bf16.msra.mxu1 %v475_v31  ;;  %v307_v14 = vld [vmem:[#allocation8 + $0xc8] sm:$0xff]  ;;  %v507_v15 = vpack.c.bf16 %v289_v12, %v288_v11  ;;  %v290_v17 = vld [vmem:[#allocation8 + $0x40] sm:$0xff]  ;;  %v308_v19 = vld [vmem:[#allocation8 + $0xd0] sm:$0xff] }
  0x5d   :  { %478 = vmatprep.subr.bf16.mxu1 %v477_v32  ;;  %v509_v16 = vpack.c.bf16 %v307_v14, %v306_v13  ;;  %v291_v18 = vld [vmem:[#allocation8 + $0x48] sm:$0xff]  ;;  %v309_v20 = vld [vmem:[#allocation8 + $0xd8] sm:$0xff]  ;;  %v292_v23 = vld [vmem:[#allocation8 + $0x50] sm:$0xff] }
  0x5e   :  { %500 = vmatpush3.bf16.msra.mxu0 %v499_v3  ;;  %v511_v21 = vpack.c.bf16 %v291_v18, %v290_v17  ;;  %v513_v22 = vpack.c.bf16 %v309_v20, %v308_v19  ;;  %v293_v24 = vld [vmem:[#allocation8 + $0x58] sm:$0xff]  ;;  %v310_v25 = vld [vmem:[#allocation8 + $0xe0] sm:$0xff]  ;;  %v311_v26 = vld [vmem:[#allocation8 + $0xe8] sm:$0xff] }
  0x5f   :  { %502 = vmatprep.subr.bf16.mxu0 %v501_v4  ;;  %v515_v27 = vpack.c.bf16 %v293_v24, %v292_v23  ;;  %v517_v28 = vpack.c.bf16 %v311_v26, %v310_v25  ;;  %v410_v29 = vld [vmem:[%s784_s2] ss:$0 sm:$0xff]  ;;  %v294_v34 = vld [vmem:[#allocation8 + $0x60] sm:$0xff]  ;;  %v296_v40 = vld [vmem:[#allocation8 + $0x70] sm:$0xff] }
  0x60   :  { %480 = vmatpush1.bf16.msra.mxu1 %v479_v37  ;;  %v295_v35 = vld [vmem:[#allocation8 + $0x68] sm:$0xff]  ;;  %v312_v37 = vld [vmem:[#allocation8 + $0xf0] sm:$0xff]  ;;  %v297_v41 = vld [vmem:[#allocation8 + $0x78] sm:$0xff] }
  0x61   :  { %482 = vmatprep.subr.bf16.mxu1 %v481_v38  ;;  %v519_v36 = vpack.c.bf16 %v295_v35, %v294_v34  ;;  %v313_v38 = vld [vmem:[#allocation8 + $0xf8] sm:$0xff]  ;;  %v523_v42 = vpack.c.bf16 %v297_v41, %v296_v40  ;;  %v197_v46 = vld [vmem:[%s786_s4] sm:$0x3]  ;;  %s399_s4 = sshll.u32 %s666_s30, 4  ;;  %s400_s4 = int_to_ptr.vmem [resolvable:$true] %s399_s4 }
  0x62   :  { %504 = vmatpush3.bf16.msra.mxu0 %v503_v9  ;;  %v521_v39 = vpack.c.bf16 %v313_v38, %v312_v37  ;;  %v412_v57 = vld [vmem:[%s788_s6] ss:$0 sm:$0xff]  ;;  %s625_s8 = scalar_lea.vmem %s400_s4, 128  ;;  %p630_p5 = scmp.lt.s32.totalorder %s400_s4, %s400_s4 }
  0x63   :  { %506 = vmatprep.subr.bf16.mxu0 %v505_v10  ;;  %p626_p4 = scmp.ne.s32.totalorder %s400_s4, %s625_s8  ;;  %p631_p6 = scmp.lt.s32.totalorder %s625_s8, %s625_s8 }
  0x64   :  { %484 = vmatpush1.bf16.msra.mxu1 %v483_v43  ;;  %v199_v43 = vlaneseq }
  0x65   :  { %486 = vmatprep.subr.bf16.mxu1 %v485_v44  ;;  %p632_p7 = por %p631_p6, %p630_p5 }
  0x66   :  { %508 = vmatpush3.bf16.msra.mxu0 %v507_v15  ;;  %v200_v44 = vshrl.u32 %v199_v43, 7 }
  0x67   :  { %510 = vmatprep.subr.bf16.mxu0 %v509_v16  ;;  %p633_p8 = pnand %p632_p7, %p626_p4 }
  0x68   :  { %488 = vmatpush1.bf16.msra.mxu1 %v487_v47  ;;  %v201_v45 = vsub.s32 0, %v200_v44  ;;  %v205_v47 = vsub.s32 1, %v200_v44 }
  0x69   :  { %490 = vmatprep.subr.bf16.mxu1 %v489_v50 }
  0x6a   :  { %512 = vmatpush3.bf16.msra.mxu0 %v511_v21  ;;  %v202_v48 = vrot.slane %v197_v46, %v201_v45  ;;  %v206_v49 = vrot.slane %v197_v46, %v205_v47 }
  0x6b   :  { %514 = vmatprep.subr.bf16.mxu0 %v513_v22 }
  0x6c   :  { %492 = vmatpush1.bf16.msra.mxu1 %v491_v53 }
  0x6e   :  { %516 = vmatpush3.bf16.msra.mxu0 %v515_v27 }
  0x6f   :  { %518 = vmatprep.subr.bf16.mxu0 %v517_v28 }
  0x72   :  { %520 = vmatpush3.bf16.msra.mxu0 %v519_v36 }
  0x73   :  { %522 = vmatprep.subr.bf16.mxu0 %v521_v39 }
  0x76   :  { %524 = vmatpush3.bf16.msra.mxu0 %v523_v42 }
 0x124   :  { %v160_v30 = vpop.f32.mrb[0].mxu0 }
 0x125   :  { %v161_v31 = vadd.f32 %v410_v29, %v160_v30  ;;  %v457_v32 = vpop.f32.mrb[1].mxu0 }
 0x127   :  { %v164_v33 = vmax.f32 %v161_v31, 0.0 }
 0x129   :  { %274 = vmatmul.mubr.f32.vlgmr.msra.gmra.mrb[0].mxu1 %v164_v33 }
 0x1fc   :  { %v275_v50 = vpop.f32.mrb[0].mxu1 }
 0x1fd   :  { %v276_v51 = vadd.f32 %v275_v50, %v202_v48  ;;  %v277_v52 = vpop.f32.mrb[1].mxu1 }
 0x1fe   :  { %v278_v53 = vadd.f32 %v277_v52, %v206_v49 }
 0x1ff   :  { %v280_v55 = vmax.f32 %v276_v51, 0.0 }
 0x200   :  { %v281_v54 = vmax.f32 %v278_v53, 0.0 }
 0x202   :  { %385 = vmatprep.mubr.f32.mxu0 %v281_v54 }
 0x203   :  { %386 = vmatmul.mubr.f32.vlgmr.msra.gmra.mrb[2].mxu0 %v280_v55 }
 0x2d6   :  { %v448_v56 = vpop.f32.mrb[2].mxu0 }
 0x2d7   :  { %v449_v58 = vpop.f32.mrb[3].mxu0 }
 0x2d8   :  { %v450_v59 = vadd.f32 %v449_v58, %v448_v56 }
 0x2da   :  { %v388_v60 = vadd.f32 %v450_v59, %v412_v57 }
 0x2dc   :  { %v391_v61 = vmax.f32 %v388_v60, 0.0 }
 0x2de   :  { %392 = vst [vmem:[#allocation10] sm:$0xff] %v391_v61 }
 0x2df   :  { %636 = shalt.err (!%p633_p8)
}
 0x2e0   :  { %s637_s13 = scalar_lea.hbm %s789_s7, 128 }
 0x2e1   :  { %p638_p9 = scmp.ne.s32.totalorder %s789_s7, %s637_s13  ;;  %p641_p10 = scmp.lt.u32.totalorder %s637_s13, %s789_s7 }
 0x2e3   :  { %p643_p11 = pnand %p641_p10, %p638_p9 }
 0x2e5   :  { %646 = shalt.err (!%p643_p11)
}
 0x2e6   :  { %402 = dma.vmem_to_hbm [thread:$0]  %s400_s4, 128, %s789_s7, [#allocation4]  }
 0x2e7   :  { %653 = dma.done.wait [#allocation4], 128  }
 0x2e8   :  { %654 = vsyncadd [#allocation4], 4294967168 }
 0x2e9   :  { %406 = vsyncpa [#allocation3], 1 }
 0x2ea   :  { %407 = vsyncpa [#allocation6], 1 }
 0x2eb   :  { %408 = vsyncpa [#allocation9], 1 }
 0x2ec   :  { %409 = vsyncpa [#allocation4], 1 }

</bundles_post_ra>
